<compile_context>
chip_gen: v5e
topology: v5e:2x2
jax: 0.10.0
libtpu: 0.0.40
codegen_flags: <defaults>
</compile_context>

<pallas_src>
import jax
import jax.numpy as jnp
from jax import lax
from jax.experimental import pallas as pl
from jax.experimental.pallas import tpu as pltpu

_LANES = 128          # lanes per vreg (fast axis)
_SUBLANES = 8         # sublanes per vreg
_MAX_BLK_ROWS = 2048  # (2048, 128) f32 block = 1 MiB; x2 inputs x2 bufs = 4 MiB
_CORE_SPLITS = 2      # leading "parallel" axis -> both TensorCores on v7x


def _make_sums_kernel(rows, blk_rows, bpc, need_mask):
    """Builds the reduction kernel for a fixed (static) tiling."""
    groups = blk_rows // _SUBLANES  # number of (8,128) sub-tiles per block

    def kernel(p_ref, a_ref, out_ref):
        c = pl.program_id(0)   # core-split index
        i = pl.program_id(1)   # row-block index within the split

        # Output block index is constant along i -> block stays resident in
        # VMEM and acts as the accumulator (P3 pattern).
        @pl.when(i == 0)
        def _init():
            out_ref[...] = jnp.zeros_like(out_ref)

        p = p_ref[...].astype(jnp.float32)
        a = a_ref[...].astype(jnp.float32)

        if need_mask:
            # Zero out rows past the real data (ragged last block and/or the
            # clamped "ghost" block of the second core split). jnp.where (not
            # multiply) so garbage/NaN padding cannot leak into the sums.
            base = (c * bpc + i) * blk_rows
            row_ids = base + lax.broadcasted_iota(
                jnp.int32, (blk_rows, _LANES), 0)
            valid = row_ids < rows
            p = jnp.where(valid, p, 0.0)
            a = jnp.where(valid, a, 0.0)

        pa = p * a

        # Fold (blk_rows,128) -> (8,128) with pure vreg-to-vreg VPU adds.
        # The reshape groups whole (8,128) sub-tiles, so no relayout occurs.
        out_ref[0, 0] += p.reshape(groups, _SUBLANES, _LANES).sum(axis=0)   # sum p
        out_ref[0, 1] += a.reshape(groups, _SUBLANES, _LANES).sum(axis=0)   # sum a
        out_ref[0, 2] += pa.reshape(groups, _SUBLANES, _LANES).sum(axis=0)  # sum pa

    return kernel


def _tversky_sums(predicted, actual):
    """Returns a (2, 3, 8, 128) f32 array of per-core partial accumulators
    for [sum(p), sum(a), sum(p*a)]."""
    p = predicted.reshape(-1)
    a = actual.reshape(-1)
    n = p.shape[0]

    # The (rows, 128) view requires n % (8*128) == 0. Typical segmentation
    # shapes are already aligned, so the common path is a free bitcast
    # reshape (no pad, no extra HBM pass). Only ragged inputs get padded.
    align = _SUBLANES * _LANES
    n_pad = pl.cdiv(n, align) * align
    if n_pad != n:
        p = jnp.pad(p, (0, n_pad - n))
        a = jnp.pad(a, (0, n_pad - n))
    rows = n_pad // _LANES

    blk_rows = min(_MAX_BLK_ROWS, rows)        # multiple of 8 by construction
    nblocks = pl.cdiv(rows, blk_rows)          # real row-blocks in the array
    bpc = pl.cdiv(nblocks, _CORE_SPLITS)       # row-blocks per core split
    # Mask only compiled in when some logical block runs past `rows`
    # (partial last block and/or ghost block when nblocks is odd).
    need_mask = (_CORE_SPLITS * bpc * blk_rows) != rows

    p = p.reshape(rows, _LANES)
    a = a.reshape(rows, _LANES)

    def in_map(c, i):
        # Clamp ghost blocks onto the last real block (never DMA out of
        # bounds); their contribution is zeroed by the in-kernel mask.
        return (jnp.minimum(c * bpc + i, nblocks - 1), 0)

    kernel = _make_sums_kernel(rows, blk_rows, bpc, need_mask)

    sums = pl.pallas_call(
        kernel,
        out_shape=jax.ShapeDtypeStruct(
            (_CORE_SPLITS, 3, _SUBLANES, _LANES), jnp.float32),
        grid_spec=pltpu.PrefetchScalarGridSpec(
            num_scalar_prefetch=0,
            grid=(_CORE_SPLITS, bpc),
            in_specs=[
                pl.BlockSpec((blk_rows, _LANES), in_map),
                pl.BlockSpec((blk_rows, _LANES), in_map),
            ],
            out_specs=pl.BlockSpec((1, 3, _SUBLANES, _LANES),
                                   lambda c, i: (c, 0, 0, 0)),
        ),
        compiler_params=pltpu.CompilerParams(
            dimension_semantics=("parallel", "arbitrary")),
    )(p, a)
    return sums


def tversky_loss(predicted, actual, smooth=1e-6):
    """Pallas-backed equivalent of TverskyLoss.forward (alpha = beta = 0.5)."""
    sums = _tversky_sums(predicted, actual)          # (2, 3, 8, 128)
    totals = jnp.sum(sums, axis=(0, 2, 3))           # (3,) = [sum_p, sum_a, tp]
    sum_p, sum_a, tp = totals[0], totals[1], totals[2]
    fp = sum_p - tp          # sum(p * (1 - a))
    fn = sum_a - tp          # sum((1 - p) * a)
    tversky_index = (tp + smooth) / (tp + 0.5 * fp + 0.5 * fn + smooth)
    return (1.0 - tversky_index).astype(jnp.float32)


def _tversky_loss_ref(predicted, actual, smooth=1e-6):
    p = predicted.reshape(-1).astype(jnp.float32)
    a = actual.reshape(-1).astype(jnp.float32)
    tp = jnp.sum(p * a)
    fp = jnp.sum(p * (1.0 - a))
    fn = jnp.sum((1.0 - p) * a)
    ti = (tp + smooth) / (tp + 0.5 * fp + 0.5 * fn + smooth)
    return 1.0 - ti


if __name__ == "__main__":
    key = jax.random.PRNGKey(0)
    k1, k2, k3, k4 = jax.random.split(key, 4)

    # Case 1: module-style example at a small (N, 1, H, W) shape.
    pred1 = jax.random.normal(k1, (2, 1, 16, 16), dtype=jnp.float32)
    act1 = jax.random.normal(k2, (2, 1, 16, 16), dtype=jnp.float32)
    loss1 = jax.block_until_ready(tversky_loss(pred1, act1))
    ref1 = jax.block_until_ready(_tversky_loss_ref(pred1, act1))
    # f32 reduction-order differences get amplified by the loss ratio on
    # unnormalized randn inputs -> modest tolerance here.
    assert jnp.allclose(loss1, ref1, rtol=1e-4, atol=1e-4), (loss1, ref1)

    # Case 2: probability-like inputs at a ragged shape; exercises the pad,
    # multi-block, partial-block and ghost-block (2-way core split) paths.
    pred2 = jax.random.uniform(k3, (3, 1, 300, 300), dtype=jnp.float32)
    act2 = (jax.random.uniform(k4, (3, 1, 300, 300)) > 0.5).astype(jnp.float32)
    loss2 = jax.block_until_ready(tversky_loss(pred2, act2))
    ref2 = jax.block_until_ready(_tversky_loss_ref(pred2, act2))
    assert jnp.allclose(loss2, ref2, rtol=1e-4, atol=1e-5), (loss2, ref2)

    print("KERNEL_OK")
</pallas_src>

<mosaic_0001>
module attributes {stable_mosaic.version = 11 : i64} {
  func.func @kernel(%arg0: i32, %arg1: i32, %arg2: memref<8x128xf32, #tpu.memory_space<vmem>>, %arg3: memref<8x128xf32, #tpu.memory_space<vmem>>, %arg4: memref<1x3x8x128xf32, #tpu.memory_space<vmem>>) attributes {dimension_semantics = [#tpu.dimension_semantics<parallel>, #tpu.dimension_semantics<arbitrary>], iteration_bounds = array<i64: 2, 1>, scalar_prefetch = 0 : i64, scratch_operands = 0 : i64, tpu.core_type = #tpu.core_type<tc>, window_params = [{transform_indices = @transform_0, window_bounds = array<i64: 8, 128>}, {transform_indices = @transform_1, window_bounds = array<i64: 8, 128>}, {transform_indices = @transform_2, window_bounds = array<i64: 1, 3, 8, 128>}]} {
    %c0_i32 = arith.constant 0 : i32
    %0 = arith.cmpi eq, %arg1, %c0_i32 : i32
    %1 = arith.extui %0 : i1 to i32
    %c0_i32_0 = arith.constant 0 : i32
    %2 = arith.cmpi ne, %1, %c0_i32_0 : i32
    scf.if %2 {
      %cst_31 = arith.constant 0.000000e+00 : f32
      %42 = vector.broadcast %cst_31 : f32 to vector<1x3x8x128xf32>
      %c0_32 = arith.constant 0 : index
      %c0_33 = arith.constant 0 : index
      %c0_34 = arith.constant 0 : index
      %c0_35 = arith.constant 0 : index
      %43 = vector.load %arg4[%c0_32, %c0_33, %c0_34, %c0_35] : memref<1x3x8x128xf32, #tpu.memory_space<vmem>>, vector<1x3x8x128xf32>
      tpu.vector_store %arg4[%c0_32, %c0_33, %c0_34, %c0_35], %42 {strides = array<i32>} : memref<1x3x8x128xf32, #tpu.memory_space<vmem>>, vector<1x3x8x128xf32>,
    } else {
    }
    %c0 = arith.constant 0 : index
    %c0_1 = arith.constant 0 : index
    %3 = vector.load %arg2[%c0, %c0_1] : memref<8x128xf32, #tpu.memory_space<vmem>>, vector<8x128xf32>
    %c0_2 = arith.constant 0 : index
    %c0_3 = arith.constant 0 : index
    %4 = vector.load %arg3[%c0_2, %c0_3] : memref<8x128xf32, #tpu.memory_space<vmem>>, vector<8x128xf32>
    %c1_i32 = arith.constant 1 : i32
    %5 = arith.muli %arg0, %c1_i32 : i32
    %6 = arith.addi %5, %arg1 : i32
    %c8_i32 = arith.constant 8 : i32
    %7 = arith.muli %6, %c8_i32 : i32
    %8 = tpu.iota {dimensions = array<i32: 0>} : vector<8x128xi32>
    %9 = vector.broadcast %7 : i32 to vector<8x128xi32>
    %10 = arith.addi %9, %8 : vector<8x128xi32>
    %c8_i32_4 = arith.constant 8 : i32
    %11 = vector.broadcast %c8_i32_4 : i32 to vector<8x128xi32>
    %12 = arith.cmpi slt, %10, %11 : vector<8x128xi32>
    %cst = arith.constant 0.000000e+00 : f32
    %13 = vector.broadcast %cst : f32 to vector<8x128xf32>
    %14 = arith.select %12, %3, %13 : vector<8x128xi1>, vector<8x128xf32>
    %cst_5 = arith.constant 0.000000e+00 : f32
    %15 = vector.broadcast %cst_5 : f32 to vector<8x128xf32>
    %16 = arith.select %12, %4, %15 : vector<8x128xi1>, vector<8x128xf32>
    %17 = arith.mulf %14, %16 : vector<8x128xf32>
    %c0_6 = arith.constant 0 : index
    %c0_7 = arith.constant 0 : index
    %c0_8 = arith.constant 0 : index
    %c0_9 = arith.constant 0 : index
    %18 = vector.load %arg4[%c0_6, %c0_7, %c0_8, %c0_9] : memref<1x3x8x128xf32, #tpu.memory_space<vmem>>, vector<1x1x8x128xf32>
    %19 = vector.shape_cast %18 : vector<1x1x8x128xf32> to vector<8x128xf32>
    %20 = vector.shape_cast %14 : vector<8x128xf32> to vector<1x8x128xf32>
    %cst_10 = arith.constant dense<0.000000e+00> : vector<8x128xf32>
    %21 = vector.multi_reduction <add>, %20, %cst_10 [0] : vector<1x8x128xf32> to vector<8x128xf32>
    %22 = arith.addf %19, %21 : vector<8x128xf32>
    %c0_11 = arith.constant 0 : index
    %c0_12 = arith.constant 0 : index
    %c0_13 = arith.constant 0 : index
    %c0_14 = arith.constant 0 : index
    %23 = vector.load %arg4[%c0_11, %c0_12, %c0_13, %c0_14] : memref<1x3x8x128xf32, #tpu.memory_space<vmem>>, vector<1x1x8x128xf32>
    %24 = vector.shape_cast %23 : vector<1x1x8x128xf32> to vector<8x128xf32>
    %25 = vector.shape_cast %22 : vector<8x128xf32> to vector<1x1x8x128xf32>
    tpu.vector_store %arg4[%c0_11, %c0_12, %c0_13, %c0_14], %25 {strides = array<i32>} : memref<1x3x8x128xf32, #tpu.memory_space<vmem>>, vector<1x1x8x128xf32>,
    %c0_15 = arith.constant 0 : index
    %c1 = arith.constant 1 : index
    %c0_16 = arith.constant 0 : index
    %c0_17 = arith.constant 0 : index
    %26 = vector.load %arg4[%c0_15, %c1, %c0_16, %c0_17] : memref<1x3x8x128xf32, #tpu.memory_space<vmem>>, vector<1x1x8x128xf32>
    %27 = vector.shape_cast %26 : vector<1x1x8x128xf32> to vector<8x128xf32>
    %28 = vector.shape_cast %16 : vector<8x128xf32> to vector<1x8x128xf32>
    %cst_18 = arith.constant dense<0.000000e+00> : vector<8x128xf32>
    %29 = vector.multi_reduction <add>, %28, %cst_18 [0] : vector<1x8x128xf32> to vector<8x128xf32>
    %30 = arith.addf %27, %29 : vector<8x128xf32>
    %c0_19 = arith.constant 0 : index
    %c1_20 = arith.constant 1 : index
    %c0_21 = arith.constant 0 : index
    %c0_22 = arith.constant 0 : index
    %31 = vector.load %arg4[%c0_19, %c1_20, %c0_21, %c0_22] : memref<1x3x8x128xf32, #tpu.memory_space<vmem>>, vector<1x1x8x128xf32>
    %32 = vector.shape_cast %31 : vector<1x1x8x128xf32> to vector<8x128xf32>
    %33 = vector.shape_cast %30 : vector<8x128xf32> to vector<1x1x8x128xf32>
    tpu.vector_store %arg4[%c0_19, %c1_20, %c0_21, %c0_22], %33 {strides = array<i32>} : memref<1x3x8x128xf32, #tpu.memory_space<vmem>>, vector<1x1x8x128xf32>,
    %c0_23 = arith.constant 0 : index
    %c2 = arith.constant 2 : index
    %c0_24 = arith.constant 0 : index
    %c0_25 = arith.constant 0 : index
    %34 = vector.load %arg4[%c0_23, %c2, %c0_24, %c0_25] : memref<1x3x8x128xf32, #tpu.memory_space<vmem>>, vector<1x1x8x128xf32>
    %35 = vector.shape_cast %34 : vector<1x1x8x128xf32> to vector<8x128xf32>
    %36 = vector.shape_cast %17 : vector<8x128xf32> to vector<1x8x128xf32>
    %cst_26 = arith.constant dense<0.000000e+00> : vector<8x128xf32>
    %37 = vector.multi_reduction <add>, %36, %cst_26 [0] : vector<1x8x128xf32> to vector<8x128xf32>
    %38 = arith.addf %35, %37 : vector<8x128xf32>
    %c0_27 = arith.constant 0 : index
    %c2_28 = arith.constant 2 : index
    %c0_29 = arith.constant 0 : index
    %c0_30 = arith.constant 0 : index
    %39 = vector.load %arg4[%c0_27, %c2_28, %c0_29, %c0_30] : memref<1x3x8x128xf32, #tpu.memory_space<vmem>>, vector<1x1x8x128xf32>
    %40 = vector.shape_cast %39 : vector<1x1x8x128xf32> to vector<8x128xf32>
    %41 = vector.shape_cast %38 : vector<8x128xf32> to vector<1x1x8x128xf32>
    tpu.vector_store %arg4[%c0_27, %c2_28, %c0_29, %c0_30], %41 {strides = array<i32>} : memref<1x3x8x128xf32, #tpu.memory_space<vmem>>, vector<1x1x8x128xf32>,
    return
  }
  func.func @transform_0(%arg0: i32, %arg1: i32) -> (i32, i32) {
    %c1_i32 = arith.constant 1 : i32
    %0 = arith.muli %arg0, %c1_i32 : i32
    %1 = arith.addi %0, %arg1 : i32
    %c0_i32 = arith.constant 0 : i32
    %2 = arith.minsi %1, %c0_i32 : i32
    %c0_i32_0 = arith.constant 0 : i32
    %c0_i32_1 = arith.constant 0 : i32
    return %2, %c0_i32_0 : i32, i32
  }
  func.func @transform_1(%arg0: i32, %arg1: i32) -> (i32, i32) {
    %c1_i32 = arith.constant 1 : i32
    %0 = arith.muli %arg0, %c1_i32 : i32
    %1 = arith.addi %0, %arg1 : i32
    %c0_i32 = arith.constant 0 : i32
    %2 = arith.minsi %1, %c0_i32 : i32
    %c0_i32_0 = arith.constant 0 : i32
    %c0_i32_1 = arith.constant 0 : i32
    return %2, %c0_i32_0 : i32, i32
  }
  func.func @transform_2(%arg0: i32, %arg1: i32) -> (i32, i32, i32, i32) {
    %c0_i32 = arith.constant 0 : i32
    %c0_i32_0 = arith.constant 0 : i32
    %c0_i32_1 = arith.constant 0 : i32
    %c0_i32_2 = arith.constant 0 : i32
    return %arg0, %c0_i32, %c0_i32_0, %c0_i32_1 : i32, i32, i32, i32
  }
}

</mosaic_0001>

<bundles_post_ra>
// kernel: tpu_custom_call.1
= control target key start
LH: loop header
LB: loop body
LE: loop exit
PB: predicated region body
PF: predicated region fallthrough
CT: control target
= control target key end

     0   :  { %7 = vsyncpa [#allocation3], 0  ;;  %s861_s0 = inlined_call_operand.hbm [shape: f32[8,128], index: 0, kind: input, shape index: {}]   ;;  %s862_s1 = inlined_call_operand.hbm [shape: f32[8,128], index: 1, kind: input, shape index: {}]   ;;  %s863_s2 = inlined_call_operand.hbm [shape: f32[2,3,8,128], index: 2, kind: output, shape index: {}]  }
   0x1   :  { %9 = vsyncpa [#allocation3 + $0x1], 0 }
   0x2   :  { %10 = vsyncpa [#allocation6], 0 }
   0x3   :  { %12 = vsyncpa [#allocation6 + $0x1], 0 }
   0x4   :  { %13 = vsyncpa [#allocation4], 0 }
   0x5   :  { %15 = vsyncpa [#allocation4 + $0x1], 0  ;;  %s692_s9 = smov 0   ;;  %s694_s10 = smov 0  }
   0x6   :  { %s696_s11 = smov 0   ;;  %s698_s12 = smov 0  }
   0x7   :  { %s700_s13 = smov 0   ;;  %s702_s14 = smov 0  }
   0x8   :  { %s704_s15 = smov 0   ;;  %s706_s16 = smov 0  }
   0x9 LB: > { %s389_s17 = sadd.s32 4294967295, %s671_s16   ;;  %s390_s18 = sadd.s32 4294967294, %s671_s16   ;;  %s671_s16 = sphi %s706_s16, %s21_s16   ;;  %s667_s15 = sphi %s704_s15, %s875_s15   ;;  %s663_s14 = sphi %s702_s14, %s874_s14   ;;  %s659_s13 = sphi %s700_s13, %s851_s13   ;;  %s655_s12 = sphi %s698_s12, %s873_s12   ;;  %s651_s11 = sphi %s696_s11, %s872_s11   ;;  %s647_s10 = sphi %s694_s10, %s871_s10   ;;  %s643_s9 = sphi %s692_s9, %s870_s9  }
   0xa   : > { %s33_s19 = sadd.s32 1, %s667_s15  ;;  %p640_p1 = scmp.ne.s32.totalorder %s659_s13, 0 }
   0xb   : > { %p35_p0 = scmp.ge.s32.totalorder %s33_s19, 2  ;;  %p54_p2 = scmp.eq.s32.totalorder %s671_s16, 0 }
   0xc   : > { %p59_p3 = scmp.ne.s32.totalorder %s659_s13, %s655_s12  ;;  %p60_p5 = scmp.eq.s32.totalorder %s389_s17, 0 }
   0xd   : > { %s877_s19 = smov (%p35_p0, %s33_s19), 0  ;;  %p738_p4 = por %p640_p1, %p54_p2 }
   0xe   : > { %p742_p6 = por %p60_p5, %p59_p3  ;;  %s101_s22 = ssub.s32 %s667_s15, %s877_s19 }
   0xf   : > { %p102_p7 = scmp.eq.s32.totalorder %s101_s22, 0  ;;  %s104_s23 = sadd.s32 1, %s651_s11 }
  0x10   : > { %p114_p8 = scmp.ne.s32.totalorder %s651_s11, %s647_s10  ;;  %p115_p9 = scmp.eq.s32.totalorder %s389_s17, 1 }
  0x11   : > { %s750_s24 = scalar_select %p102_p7, %s651_s11, %s104_s23  }
  0x12   : > { %p120_p10 = scmp.ne.s32.totalorder %s647_s10, %s643_s9  ;;  %p121_p11 = scmp.eq.s32.totalorder %s390_s18, 1 }
  0x13   : > { %p756_p12 = por %p115_p9, %p114_p8  ;;  %p392_p13 = scmp.ge.s32.totalorder %s671_s16, 2 }
  0x14   : > { %p761_p0 = por %p121_p11, %p120_p10  ;;  %p427_p1 = scmp.lt.s32.totalorder %s671_s16, 2 }
  0x15   : > { %s154_s29 = sshll.u32 %s861_s0, 4  ;;  %s673_s30 = smov [#allocation2]   ;;  %s155_s29 = int_to_ptr.hbm [resolvable:$true] %s154_s29 }
  0x16   : > { %s156_s3 = sshll.u32 %s673_s30, 4  ;;  %p771_p2 = pnand %p427_p1, %p738_p4  ;;  %s157_s3 = int_to_ptr.vmem [resolvable:$true] %s156_s3 }
  0x17   : > { %p397_p3 = scmp.ge.s32.totalorder %s671_s16, 1  ;;  %p183_p5 = scmp.lt.s32.totalorder %s671_s16, 3 }
  0x18   : > { %s504_s5 = sshra.s32 %s155_s29, 4  ;;  %p508_p8 = pneg %p771_p2  ;;  %s505_s5 = int_to_ptr.hbm [resolvable:$true] %s504_s5 }
  0x19   : > { %s506_s6 = scalar_lea.hbm %s505_s5, 8  ;;  %s511_s12 = scalar_lea.hbm %s861_s0, 8 }
  0x1a   : > { %p507_p7 = scmp.ne.s32.totalorder %s505_s5, %s506_s6  ;;  %p513_p4 = scmp.lt.s32.totalorder %s511_s12, %s506_s6 }
  0x1c   : > { %p509_p9 = pnand %p508_p8, %p507_p7 }
  0x1e   : > { %p510_p10 = pneg %p509_p9 }
  0x20   : > { %p515_p11 = pnand %p513_p4, %p510_p10 }
  0x22   : > { %518 = shalt.err (!%p515_p11)
}
  0x23   : > { %419 = dma.hbm_to_vmem [thread:$0]  (!%p771_p2), %s155_s29, 128, %s157_s3, [#allocation3]  }
  0x24   : > { %p791_p1 = pnand %p397_p3, %p183_p5  ;;  %s176_s22 = sshll.u32 %s862_s1, 4  ;;  %s177_s22 = int_to_ptr.hbm [resolvable:$true] %s176_s22 }
  0x25   : > { %s674_s23 = smov [#allocation5]   ;;  %s534_s28 = sshra.s32 %s177_s22, 4  ;;  %s535_s28 = int_to_ptr.hbm [resolvable:$true] %s534_s28 }
  0x26   : > { %s178_s27 = sshll.u32 %s674_s23, 4  ;;  %s536_s30 = scalar_lea.hbm %s535_s28, 8  ;;  %s179_s27 = int_to_ptr.vmem [resolvable:$true] %s178_s27 }
  0x27   : > { %p537_p7 = scmp.ne.s32.totalorder %s535_s28, %s536_s30  ;;  %s541_s5 = scalar_lea.hbm %s862_s1, 8 }
  0x28   : > { %p543_p3 = scmp.lt.s32.totalorder %s541_s5, %s536_s30 }
  0x29   : > { %p539_p9 = pnand %p537_p7, %p508_p8 }
  0x2b   : > { %p540_p10 = pneg %p539_p9 }
  0x2d   : > { %p545_p5 = pnand %p543_p3, %p540_p10 }
  0x2f   : > { %548 = shalt.err (!%p545_p5)
}
  0x30   : > { %422 = dma.hbm_to_vmem [thread:$0]  (!%p771_p2), %s177_s22, 128, %s179_s27, [#allocation6]  }
  0x31   : > { %187 = sbr.rel (%p791_p1) target bundleno = 76 (0x4c), region = 28  ;;  %s189_s6 = sand.u32 (!%p791_p1), 1, %s659_s13  }
  0x32   : > { %s398_s7 = sshll.u32 (!%p791_p1), %s189_s6, 3  ;;  %s190_s8 = scalar_lea.sflag (!%p791_p1), [#allocation3], %s189_s6 }
  0x33   : > { %s193_s12 = scalar_lea.vmem (!%p791_p1), [#allocation2], %s398_s7 }
  0x36   : > { %629 = dma.done.wait (%p742_p6), %s190_s8, 128  }
  0x37   : > { %631 = vsyncadd (%p742_p6), %s190_s8, 4294967168  ;;  %s200_s18 = scalar_lea.sflag [#allocation6], %s189_s6  ;;  %s203_s20 = scalar_lea.vmem [#allocation5], %s398_s7 }
  0x38   : > { %633 = dma.done.wait (%p742_p6), %s200_s18, 128  }
  0x39   : > { %635 = vsyncadd (%p742_p6), %s200_s18, 4294967168  ;;  %s227_s4 = sand.u32 1, %s647_s10   ;;  %s400_s17 = sshll.u32 %s663_s14, 3  ;;  %v247_v0 = vlaneseq  ;;  %v243_v4 = vld [vmem:[%s193_s12] sm:$0xff]  ;;  %v244_v5 = vld [vmem:[%s203_s20] sm:$0xff] }
  0x3a   : > { %s408_s22 = smul.u32 24, %s227_s4  ;;  %v249_v1 = vstv %s400_s17  ;;  %s584_s12 = scalar_lea.hbm %s863_s2, 48 }
  0x3b   : > { %v248_v2 = vshrl.u32 %v247_v0, 7  ;;  %s409_s23 = smul.u32 24, %s663_s14  ;;  %s270_s14 = scalar_lea.sflag [#allocation4], %s227_s4 }
  0x3c   : > { %s229_s21 = scalar_lea.vmem [#allocation7], %s408_s22 }
  0x3d   : > { %v250_v3 = vadd.s32 %v249_v1, %v248_v2  ;;  %s281_s30 = scalar_lea.hbm %s863_s2, %s409_s23  ;;  %s282_s29 = sshll.u32 %s229_s21, 4  ;;  %s283_s29 = int_to_ptr.vmem [resolvable:$true] %s282_s29 }
  0x3e   : > { %s284_s3 = sshll.u32 %s281_s30, 4  ;;  %s285_s3 = int_to_ptr.hbm [resolvable:$true] %s284_s3 }
  0x3f   : > { %vm251_vm0 = vcmp.lt.s32.totalorder %v250_v3, 8  ;;  %s578_s5 = sshra.s32 %s285_s3, 4  ;;  %s579_s5 = int_to_ptr.hbm [resolvable:$true] %s578_s5 }
  0x40   : > { %v252_v6 = vsel %vm251_vm0, %v243_v4, 0.0  ;;  %v253_v7 = vsel %vm251_vm0, %v244_v5, 0.0  ;;  %s580_s6 = scalar_lea.hbm %s579_s5, 24  ;;  %p585_p4 = scmp.lt.s32.totalorder %s579_s5, %s863_s2 }
  0x41   : > { %v254_v8 = vmul.f32 %v253_v7, %v252_v6  ;;  %258 = vst [vmem:[%s229_s21] sm:$0xff] %v252_v6  ;;  %p581_p6 = scmp.ne.s32.totalorder %s579_s5, %s580_s6  ;;  %p586_p11 = scmp.lt.s32.totalorder %s584_s12, %s580_s6 }
  0x42   : > { %402 = vst [vmem:[%s229_s21 + $0x8] sm:$0xff] %v253_v7 }
  0x43   : > { %404 = vst [vmem:[%s229_s21 + $0x10] sm:$0xff] %v254_v8  ;;  %p582_p2 = pnand %p581_p6, %p756_p12  ;;  %p587_p1 = por %p586_p11, %p585_p4 }
  0x45   : > { %p583_p8 = pneg %p582_p2 }
  0x47   : > { %p588_p7 = pnand %p587_p1, %p583_p8 }
  0x49   : > { %591 = shalt.err (!%p588_p7)
}
  0x4a   : > { %s675_s4 = smov 128   ;;  %s676_s17 = smov 8  }
  0x4b   : > { %414 = dma.vmem_to_hbm [thread:$0]  (%p756_p12), %s283_s29, 384, %s285_s3, %s270_s14, %s675_s4, %s675_s4, %s676_s17  }
  0x4c PF: > { %s299_s22 = sand.u32 1, %s643_s9   ;;  %p424_p9 = pnand %p392_p13, %p761_p0 }
  0x4d   : > { %s300_s23 = scalar_lea.sflag [#allocation4], %s299_s22 }
  0x4e   : > { %p425_p10 = pneg %p424_p9 }
  0x50   : > { %637 = dma.done.wait (%p425_p10), %s300_s23, 384  }
  0x51   : > { %639 = vsyncadd (%p425_p10), %s300_s23, 4294966912  ;;  %s21_s16 = sadd.s32 1, %s671_s16   ;;  %s870_s9 = smov %s647_s10 }
  0x52   : > { %p18_p3 = scmp.ge.s32.totalorder %s21_s16, 4   ;;  %s871_s10 = smov %s651_s11 }
  0x53   : > { %s872_s11 = smov %s750_s24  ;;  %s873_s12 = smov %s659_s13 }
  0x54   : > { %s851_s13 = smov 0   ;;  %s874_s14 = smov %s667_s15 }
  0x55   : > { %s875_s15 = smov %s877_s19  ;;  %20 = sbr.rel (!%p18_p3) target bundleno = 9 (0x9), region = 92 }
  0x5a   :  { %306 = vsyncpa [#allocation3], 1 }
  0x5b   :  { %308 = vsyncpa [#allocation3 + $0x1], 1 }
  0x5c   :  { %309 = vsyncpa [#allocation6], 1 }
  0x5d   :  { %311 = vsyncpa [#allocation6 + $0x1], 1 }
  0x5e   :  { %312 = vsyncpa [#allocation4], 1 }
  0x5f   :  { %314 = vsyncpa [#allocation4 + $0x1], 1 }

</bundles_post_ra>
